<compile_context>
chip_gen: v7x
topology: tpu7x:2x2x1
jax: 0.10.0
libtpu: 0.0.40
codegen_flags: <defaults>
</compile_context>

<pallas_src>
import functools

import jax
import jax.numpy as jnp
from jax.experimental import pallas as pl
from jax.experimental.pallas import tpu as pltpu


def _round_up(x, m):
    return (x + m - 1) // m * m


# ---------------------------------------------------------------------------
# Fused kernel: unrolled expand + squeeze stack, everything VMEM-resident.
# ---------------------------------------------------------------------------
def _make_fused_kernel(n_expand, n_squeeze, skip_connection):
    """Build the kernel body for a given (static) layer structure."""

    def kernel(x_ref, w_ref, b_ref, o_ref):
        def layer(h, idx):
            w = w_ref[idx]                       # (P, P)  bf16 fused weight
            b = b_ref[idx]                       # (1, P)  f32  fused bias
            acc = jnp.dot(h.astype(jnp.bfloat16), w,
                          preferred_element_type=jnp.float32)
            return jnp.maximum(acc + b, 0.0)     # bias/ReLU in f32 (VPU)

        h = x_ref[...]                           # (bm, P) f32, lane-dense
        x_expand = [h]
        for l in range(n_expand):
            h = layer(h, l)
            x_expand.append(h)
        for i in range(n_squeeze):
            h = layer(h, n_expand + i)
            if skip_connection:
                h = h + x_expand[-(i + 2)]       # skip added after activation
        o_ref[...] = h

    return kernel


def expand_and_squeeze(x, w_packed, b_packed, *, features_size, n_expand,
                       n_squeeze, skip_connection=True, block_m=128):
    """Fused forward: one pallas_call for the whole expand+squeeze stack.

    w_packed: (L, P, P) bf16 fused+padded weights, b_packed: (L, 1, P) f32.
    """
    m, f = x.shape
    L, P, _ = w_packed.shape

    bm = min(block_m, _round_up(m, 8))
    m_blocks = pl.cdiv(m, bm)
    m_total = m_blocks * bm

    # Zero-pad batch (sublane multiple) and features (lane-dense P).
    x_pad = jnp.zeros((m_total, P), jnp.float32).at[:m, :f].set(
        x.astype(jnp.float32))

    kernel = _make_fused_kernel(n_expand, n_squeeze, skip_connection)

    out = pl.pallas_call(
        kernel,
        out_shape=jax.ShapeDtypeStruct((m_total, P), jnp.float32),
        grid=(m_blocks,),
        in_specs=[
            pl.BlockSpec((bm, P), lambda i: (i, 0)),        # activations
            pl.BlockSpec((L, P, P), lambda i: (0, 0, 0)),   # all weights (1 DMA)
            pl.BlockSpec((L, 1, P), lambda i: (0, 0, 0)),   # all biases  (1 DMA)
        ],
        out_specs=pl.BlockSpec((bm, P), lambda i: (i, 0)),
        compiler_params=pltpu.CompilerParams(
            dimension_semantics=("parallel",)),
    )(x_pad, w_packed, b_packed)

    return out[:m, :features_size]


# ---------------------------------------------------------------------------
# Parameter prep: fuse crossover + dropout(identity) + transform + BN(eval)
# into a single (W, b) per block, zero-pad to (P, P), pack all blocks into
# one bf16 weight slab and one f32 bias slab.  Done ONCE, outside forward.
# ---------------------------------------------------------------------------
def fuse_linear_block_params(p, pad_to, eps=1e-5):
    scale = p["gamma"] / jnp.sqrt(p["rvar"] + eps)
    shift = p["beta"] - p["rmean"] * scale
    w = p["wc"] @ p["wt"]                      # crossover then transform
    b = p["bc"] @ p["wt"] + p["bt"]
    w = w * scale[None, :]                     # fold BN affine
    b = b * scale + shift
    f_in, f_out = w.shape
    w_pad = jnp.zeros((pad_to, pad_to), jnp.float32).at[:f_in, :f_out].set(w)
    b_pad = jnp.zeros((1, pad_to), jnp.float32).at[0, :f_out].set(b)
    return w_pad, b_pad


def pack_expand_and_squeeze_params(expand_params, squeeze_params):
    dims = [p["wc"].shape[0] for p in expand_params] + \
           [p["wt"].shape[1] for p in expand_params] + \
           [p["wt"].shape[1] for p in squeeze_params]
    pad_to = max(128, _round_up(max(dims), 128))
    fused = [fuse_linear_block_params(p, pad_to)
             for p in list(expand_params) + list(squeeze_params)]
    w_packed = jnp.stack([w for w, _ in fused]).astype(jnp.bfloat16)  # (L,P,P)
    b_packed = jnp.stack([b for _, b in fused]).astype(jnp.float32)   # (L,1,P)
    return w_packed, b_packed


# ---------------------------------------------------------------------------
# Deterministic synthetic params (shapes match the torch module) + references.
# ---------------------------------------------------------------------------
def init_linear_block_params(key, f_in, f_out):
    kwc, kbc, kwt, kbt = jax.random.split(key, 4)
    lim = 1.0 / jnp.sqrt(f_in)
    return {
        # weights stored pre-transposed: (F_in, F_out) so forward is x @ W + b
        "wc": jax.random.uniform(kwc, (f_in, f_in), jnp.float32, -lim, lim),
        "bc": jax.random.uniform(kbc, (f_in,), jnp.float32, -lim, lim),
        "wt": jax.random.uniform(kwt, (f_in, f_out), jnp.float32, -lim, lim),
        "bt": jax.random.uniform(kbt, (f_out,), jnp.float32, -lim, lim),
        "gamma": jnp.ones((f_out,), jnp.float32),
        "beta": jnp.zeros((f_out,), jnp.float32),
        "rmean": jnp.zeros((f_out,), jnp.float32),   # BatchNorm running mean
        "rvar": jnp.ones((f_out,), jnp.float32),     # BatchNorm running var
    }


def init_expand_and_squeeze(key, features_size, stack_size):
    dims = [features_size] + list(stack_size)
    expand_pairs = list(zip(dims[:-1], dims[1:]))
    rdims = dims[::-1]
    squeeze_pairs = list(zip(rdims[:-1], rdims[1:]))
    keys = jax.random.split(key, len(expand_pairs) + len(squeeze_pairs))
    expand_params = [init_linear_block_params(k, fi, fo)
                     for k, (fi, fo) in zip(keys[:len(expand_pairs)], expand_pairs)]
    squeeze_params = [init_linear_block_params(k, fi, fo)
                      for k, (fi, fo) in zip(keys[len(expand_pairs):], squeeze_pairs)]
    return expand_params, squeeze_params


def _linear_block_ref(x, p, eps=1e-5):
    # Pure-JAX reference: unfused two-matmul chain + BN(eval) + ReLU, all f32.
    h = x @ p["wc"] + p["bc"]
    # Dropout is identity in eval mode.
    h = h @ p["wt"] + p["bt"]
    scale = p["gamma"] / jnp.sqrt(p["rvar"] + eps)
    shift = p["beta"] - p["rmean"] * scale
    return jnp.maximum(h * scale + shift, 0.0)


def expand_and_squeeze_ref(x, expand_params, squeeze_params, skip_connection=True):
    xs = [x]
    for p in expand_params:
        xs.append(_linear_block_ref(xs[-1], p))
    out = xs[-1]
    for i, p in enumerate(squeeze_params):
        out = _linear_block_ref(out, p)
        if skip_connection:
            out = out + xs[-(i + 2)]
    return out


def expand_and_squeeze_bf16_emul(x, w_packed, b_packed, *, features_size,
                                 n_expand, n_squeeze, skip_connection=True):
    # Pure-JAX emulation of exactly what the kernel computes (padded, bf16
    # dot operands, f32 accumulation / elementwise).
    m, f = x.shape
    P = w_packed.shape[1]
    h = jnp.zeros((m, P), jnp.float32).at[:, :f].set(x)
    xs = [h]
    for l in range(n_expand):
        acc = jnp.dot(h.astype(jnp.bfloat16), w_packed[l],
                      preferred_element_type=jnp.float32)
        h = jnp.maximum(acc + b_packed[l], 0.0)
        xs.append(h)
    for i in range(n_squeeze):
        l = n_expand + i
        acc = jnp.dot(h.astype(jnp.bfloat16), w_packed[l],
                      preferred_element_type=jnp.float32)
        h = jnp.maximum(acc + b_packed[l], 0.0)
        if skip_connection:
            h = h + xs[-(i + 2)]
    return h[:, :features_size]


# ---------------------------------------------------------------------------
if __name__ == "__main__":
    features_size = 32
    stack_size = [64, 128, 256]
    batch = 8

    key = jax.random.PRNGKey(0)
    kx, kp, kx2 = jax.random.split(key, 3)
    x = jax.random.normal(kx, (batch, features_size), jnp.float32)

    expand_params, squeeze_params = init_expand_and_squeeze(
        kp, features_size, stack_size)
    n_expand, n_squeeze = len(expand_params), len(squeeze_params)

    # Fuse (crossover, transform, BN-eval) + pad + pack ONCE, outside forward.
    w_packed, b_packed = pack_expand_and_squeeze_params(
        expand_params, squeeze_params)

    fwd = jax.jit(functools.partial(
        expand_and_squeeze, features_size=features_size,
        n_expand=n_expand, n_squeeze=n_squeeze, skip_connection=True))

    out = fwd(x, w_packed, b_packed)
    out = jax.block_until_ready(out)

    assert out.shape == (batch, features_size), out.shape
    assert bool(jnp.all(jnp.isfinite(out)))

    # 1) Exact-path check vs a pure-JAX emulation of the same fused bf16 math.
    emul = expand_and_squeeze_bf16_emul(
        x, w_packed, b_packed, features_size=features_size,
        n_expand=n_expand, n_squeeze=n_squeeze, skip_connection=True)
    assert bool(jnp.allclose(out, emul, rtol=1e-3, atol=1e-3)), (
        float(jnp.max(jnp.abs(out - emul))))

    # 2) Semantic check vs the unfused full-f32 reference (fusion + bf16
    #    weights change rounding order -> loose tolerance).
    ref = expand_and_squeeze_ref(x, expand_params, squeeze_params,
                                 skip_connection=True)
    assert bool(jnp.allclose(out, ref, rtol=5e-2, atol=5e-2)), (
        float(jnp.max(jnp.abs(out - ref))))

    # 3) Exercise the M-grid path (multi-block, parallel across TCs on v7x).
    x_big = jax.random.normal(kx2, (256, features_size), jnp.float32)
    out_big = jax.block_until_ready(fwd(x_big, w_packed, b_packed))
    ref_big = expand_and_squeeze_ref(x_big, expand_params, squeeze_params,
                                     skip_connection=True)
    assert out_big.shape == (256, features_size)
    assert bool(jnp.allclose(out_big, ref_big, rtol=5e-2, atol=5e-2)), (
        float(jnp.max(jnp.abs(out_big - ref_big))))

    # TODO(synk): training-mode Dropout / batch-statistics BatchNorm are not
    # implemented (eval-mode forward only); fused (W, b) must be re-derived
    # whenever BatchNorm running stats change.
    print("KERNEL_OK")
</pallas_src>

<mosaic_0001>
module attributes {stable_mosaic.version = 11 : i64} {
  func.func @kernel(%arg0: i32, %arg1: memref<8x256xf32, #tpu.memory_space<vmem>>, %arg2: memref<6x256x256xbf16, #tpu.memory_space<vmem>>, %arg3: memref<6x1x256xf32, #tpu.memory_space<vmem>>, %arg4: memref<8x256xf32, #tpu.memory_space<vmem>>) attributes {dimension_semantics = [#tpu.dimension_semantics<parallel>], iteration_bounds = array<i64: 1>, scalar_prefetch = 0 : i64, scratch_operands = 0 : i64, tpu.core_type = #tpu.core_type<tc>, window_params = [{transform_indices = @transform_0, window_bounds = array<i64: 8, 256>}, {pipeline_mode = #tpu.pipeline_mode<synchronous>, transform_indices = @transform_1, window_bounds = array<i64: 6, 256, 256>}, {pipeline_mode = #tpu.pipeline_mode<synchronous>, transform_indices = @transform_2, window_bounds = array<i64: 6, 1, 256>}, {transform_indices = @transform_3, window_bounds = array<i64: 8, 256>}]} {
    %c0 = arith.constant 0 : index
    %c0_0 = arith.constant 0 : index
    %0 = vector.load %arg1[%c0, %c0_0] : memref<8x256xf32, #tpu.memory_space<vmem>>, vector<8x256xf32>
    %c0_1 = arith.constant 0 : index
    %c0_2 = arith.constant 0 : index
    %c0_3 = arith.constant 0 : index
    %1 = vector.load %arg2[%c0_1, %c0_2, %c0_3] : memref<6x256x256xbf16, #tpu.memory_space<vmem>>, vector<1x256x256xbf16>
    %2 = vector.shape_cast %1 : vector<1x256x256xbf16> to vector<256x256xbf16>
    %c0_4 = arith.constant 0 : index
    %c0_5 = arith.constant 0 : index
    %c0_6 = arith.constant 0 : index
    %3 = vector.load %arg3[%c0_4, %c0_5, %c0_6] : memref<6x1x256xf32, #tpu.memory_space<vmem>>, vector<1x1x256xf32>
    %4 = vector.shape_cast %3 : vector<1x1x256xf32> to vector<1x256xf32>
    %5 = arith.truncf %0 : vector<8x256xf32> to vector<8x256xbf16>
    %cst = arith.constant dense<0.000000e+00> : vector<8x256xf32>
    %6 = tpu.matmul %5, %2, %cst {dimension_numbers = #tpu.dot_dimension_numbers<[1], [0], [0], [1], [0, 0, 1, 1], [], []>} : vector<8x256xbf16>, vector<256x256xbf16>, vector<8x256xf32> -> vector<8x256xf32>
    %7 = vector.broadcast %4 : vector<1x256xf32> to vector<8x256xf32>
    %8 = arith.addf %6, %7 : vector<8x256xf32>
    %cst_7 = arith.constant 0.000000e+00 : f32
    %9 = vector.broadcast %cst_7 : f32 to vector<8x256xf32>
    %10 = arith.maximumf %8, %9 : vector<8x256xf32>
    %c1 = arith.constant 1 : index
    %c0_8 = arith.constant 0 : index
    %c0_9 = arith.constant 0 : index
    %11 = vector.load %arg2[%c1, %c0_8, %c0_9] : memref<6x256x256xbf16, #tpu.memory_space<vmem>>, vector<1x256x256xbf16>
    %12 = vector.shape_cast %11 : vector<1x256x256xbf16> to vector<256x256xbf16>
    %c1_10 = arith.constant 1 : index
    %c0_11 = arith.constant 0 : index
    %c0_12 = arith.constant 0 : index
    %13 = vector.load %arg3[%c1_10, %c0_11, %c0_12] : memref<6x1x256xf32, #tpu.memory_space<vmem>>, vector<1x1x256xf32>
    %14 = vector.shape_cast %13 : vector<1x1x256xf32> to vector<1x256xf32>
    %15 = arith.truncf %10 : vector<8x256xf32> to vector<8x256xbf16>
    %cst_13 = arith.constant dense<0.000000e+00> : vector<8x256xf32>
    %16 = tpu.matmul %15, %12, %cst_13 {dimension_numbers = #tpu.dot_dimension_numbers<[1], [0], [0], [1], [0, 0, 1, 1], [], []>} : vector<8x256xbf16>, vector<256x256xbf16>, vector<8x256xf32> -> vector<8x256xf32>
    %17 = vector.broadcast %14 : vector<1x256xf32> to vector<8x256xf32>
    %18 = arith.addf %16, %17 : vector<8x256xf32>
    %cst_14 = arith.constant 0.000000e+00 : f32
    %19 = vector.broadcast %cst_14 : f32 to vector<8x256xf32>
    %20 = arith.maximumf %18, %19 : vector<8x256xf32>
    %c2 = arith.constant 2 : index
    %c0_15 = arith.constant 0 : index
    %c0_16 = arith.constant 0 : index
    %21 = vector.load %arg2[%c2, %c0_15, %c0_16] : memref<6x256x256xbf16, #tpu.memory_space<vmem>>, vector<1x256x256xbf16>
    %22 = vector.shape_cast %21 : vector<1x256x256xbf16> to vector<256x256xbf16>
    %c2_17 = arith.constant 2 : index
    %c0_18 = arith.constant 0 : index
    %c0_19 = arith.constant 0 : index
    %23 = vector.load %arg3[%c2_17, %c0_18, %c0_19] : memref<6x1x256xf32, #tpu.memory_space<vmem>>, vector<1x1x256xf32>
    %24 = vector.shape_cast %23 : vector<1x1x256xf32> to vector<1x256xf32>
    %25 = arith.truncf %20 : vector<8x256xf32> to vector<8x256xbf16>
    %cst_20 = arith.constant dense<0.000000e+00> : vector<8x256xf32>
    %26 = tpu.matmul %25, %22, %cst_20 {dimension_numbers = #tpu.dot_dimension_numbers<[1], [0], [0], [1], [0, 0, 1, 1], [], []>} : vector<8x256xbf16>, vector<256x256xbf16>, vector<8x256xf32> -> vector<8x256xf32>
    %27 = vector.broadcast %24 : vector<1x256xf32> to vector<8x256xf32>
    %28 = arith.addf %26, %27 : vector<8x256xf32>
    %cst_21 = arith.constant 0.000000e+00 : f32
    %29 = vector.broadcast %cst_21 : f32 to vector<8x256xf32>
    %30 = arith.maximumf %28, %29 : vector<8x256xf32>
    %c3 = arith.constant 3 : index
    %c0_22 = arith.constant 0 : index
    %c0_23 = arith.constant 0 : index
    %31 = vector.load %arg2[%c3, %c0_22, %c0_23] : memref<6x256x256xbf16, #tpu.memory_space<vmem>>, vector<1x256x256xbf16>
    %32 = vector.shape_cast %31 : vector<1x256x256xbf16> to vector<256x256xbf16>
    %c3_24 = arith.constant 3 : index
    %c0_25 = arith.constant 0 : index
    %c0_26 = arith.constant 0 : index
    %33 = vector.load %arg3[%c3_24, %c0_25, %c0_26] : memref<6x1x256xf32, #tpu.memory_space<vmem>>, vector<1x1x256xf32>
    %34 = vector.shape_cast %33 : vector<1x1x256xf32> to vector<1x256xf32>
    %35 = arith.truncf %30 : vector<8x256xf32> to vector<8x256xbf16>
    %cst_27 = arith.constant dense<0.000000e+00> : vector<8x256xf32>
    %36 = tpu.matmul %35, %32, %cst_27 {dimension_numbers = #tpu.dot_dimension_numbers<[1], [0], [0], [1], [0, 0, 1, 1], [], []>} : vector<8x256xbf16>, vector<256x256xbf16>, vector<8x256xf32> -> vector<8x256xf32>
    %37 = vector.broadcast %34 : vector<1x256xf32> to vector<8x256xf32>
    %38 = arith.addf %36, %37 : vector<8x256xf32>
    %cst_28 = arith.constant 0.000000e+00 : f32
    %39 = vector.broadcast %cst_28 : f32 to vector<8x256xf32>
    %40 = arith.maximumf %38, %39 : vector<8x256xf32>
    %41 = arith.addf %40, %20 : vector<8x256xf32>
    %c4 = arith.constant 4 : index
    %c0_29 = arith.constant 0 : index
    %c0_30 = arith.constant 0 : index
    %42 = vector.load %arg2[%c4, %c0_29, %c0_30] : memref<6x256x256xbf16, #tpu.memory_space<vmem>>, vector<1x256x256xbf16>
    %43 = vector.shape_cast %42 : vector<1x256x256xbf16> to vector<256x256xbf16>
    %c4_31 = arith.constant 4 : index
    %c0_32 = arith.constant 0 : index
    %c0_33 = arith.constant 0 : index
    %44 = vector.load %arg3[%c4_31, %c0_32, %c0_33] : memref<6x1x256xf32, #tpu.memory_space<vmem>>, vector<1x1x256xf32>
    %45 = vector.shape_cast %44 : vector<1x1x256xf32> to vector<1x256xf32>
    %46 = arith.truncf %41 : vector<8x256xf32> to vector<8x256xbf16>
    %cst_34 = arith.constant dense<0.000000e+00> : vector<8x256xf32>
    %47 = tpu.matmul %46, %43, %cst_34 {dimension_numbers = #tpu.dot_dimension_numbers<[1], [0], [0], [1], [0, 0, 1, 1], [], []>} : vector<8x256xbf16>, vector<256x256xbf16>, vector<8x256xf32> -> vector<8x256xf32>
    %48 = vector.broadcast %45 : vector<1x256xf32> to vector<8x256xf32>
    %49 = arith.addf %47, %48 : vector<8x256xf32>
    %cst_35 = arith.constant 0.000000e+00 : f32
    %50 = vector.broadcast %cst_35 : f32 to vector<8x256xf32>
    %51 = arith.maximumf %49, %50 : vector<8x256xf32>
    %52 = arith.addf %51, %10 : vector<8x256xf32>
    %c5 = arith.constant 5 : index
    %c0_36 = arith.constant 0 : index
    %c0_37 = arith.constant 0 : index
    %53 = vector.load %arg2[%c5, %c0_36, %c0_37] : memref<6x256x256xbf16, #tpu.memory_space<vmem>>, vector<1x256x256xbf16>
    %54 = vector.shape_cast %53 : vector<1x256x256xbf16> to vector<256x256xbf16>
    %c5_38 = arith.constant 5 : index
    %c0_39 = arith.constant 0 : index
    %c0_40 = arith.constant 0 : index
    %55 = vector.load %arg3[%c5_38, %c0_39, %c0_40] : memref<6x1x256xf32, #tpu.memory_space<vmem>>, vector<1x1x256xf32>
    %56 = vector.shape_cast %55 : vector<1x1x256xf32> to vector<1x256xf32>
    %57 = arith.truncf %52 : vector<8x256xf32> to vector<8x256xbf16>
    %cst_41 = arith.constant dense<0.000000e+00> : vector<8x256xf32>
    %58 = tpu.matmul %57, %54, %cst_41 {dimension_numbers = #tpu.dot_dimension_numbers<[1], [0], [0], [1], [0, 0, 1, 1], [], []>} : vector<8x256xbf16>, vector<256x256xbf16>, vector<8x256xf32> -> vector<8x256xf32>
    %59 = vector.broadcast %56 : vector<1x256xf32> to vector<8x256xf32>
    %60 = arith.addf %58, %59 : vector<8x256xf32>
    %cst_42 = arith.constant 0.000000e+00 : f32
    %61 = vector.broadcast %cst_42 : f32 to vector<8x256xf32>
    %62 = arith.maximumf %60, %61 : vector<8x256xf32>
    %63 = arith.addf %62, %0 : vector<8x256xf32>
    %c0_43 = arith.constant 0 : index
    %c0_44 = arith.constant 0 : index
    %64 = vector.load %arg4[%c0_43, %c0_44] : memref<8x256xf32, #tpu.memory_space<vmem>>, vector<8x256xf32>
    tpu.vector_store %arg4[%c0_43, %c0_44], %63 {strides = array<i32>} : memref<8x256xf32, #tpu.memory_space<vmem>>, vector<8x256xf32>,
    return
  }
  func.func @transform_0(%arg0: i32) -> (i32, i32) {
    %c0_i32 = arith.constant 0 : i32
    %c0_i32_0 = arith.constant 0 : i32
    return %arg0, %c0_i32 : i32, i32
  }
  func.func @transform_1(%arg0: i32) -> (i32, i32, i32) {
    %c0_i32 = arith.constant 0 : i32
    %c0_i32_0 = arith.constant 0 : i32
    %c0_i32_1 = arith.constant 0 : i32
    %c0_i32_2 = arith.constant 0 : i32
    return %c0_i32, %c0_i32_0, %c0_i32_1 : i32, i32, i32
  }
  func.func @transform_2(%arg0: i32) -> (i32, i32, i32) {
    %c0_i32 = arith.constant 0 : i32
    %c0_i32_0 = arith.constant 0 : i32
    %c0_i32_1 = arith.constant 0 : i32
    %c0_i32_2 = arith.constant 0 : i32
    return %c0_i32, %c0_i32_0, %c0_i32_1 : i32, i32, i32
  }
  func.func @transform_3(%arg0: i32) -> (i32, i32) {
    %c0_i32 = arith.constant 0 : i32
    %c0_i32_0 = arith.constant 0 : i32
    return %arg0, %c0_i32 : i32, i32
  }
}

</mosaic_0001>

<bundles_post_ra>
// kernel: expand_and_squeeze.1
= control target key start
LH: loop header
LB: loop body
LE: loop exit
PB: predicated region body
PF: predicated region fallthrough
CT: control target
= control target key end

     0   :  { %8 = vsyncpa [#allocation3], 0  ;;  %s2060_s12 = smov [#allocation2]   ;;  %s2169_s0 = inlined_call_operand.vmem [shape: f32[8,256], index: 0, kind: input, shape index: {}]   ;;  %s2170_s1 = inlined_call_operand.hbm [shape: bf16[6,256,256], index: 1, kind: input, shape index: {}]   ;;  %s2171_s2 = inlined_call_operand.vmem [shape: f32[6,1,256], index: 2, kind: input, shape index: {}]   ;;  %s2172_s3 = inlined_call_operand.vmem [shape: f32[8,256], index: 3, kind: output, shape index: {}]  }
   0x1   :  { %s16_s13 = sshll.u32 %s2060_s12, 4  ;;  %s2036_s16 = scalar_lea.hbm %s2170_s1, 24576  ;;  %s17_s13 = int_to_ptr.vmem [resolvable:$true] %s16_s13 }
   0x2   :  { %p2037_p0 = scmp.ne.s32.totalorder %s2170_s1, %s2036_s16  ;;  %p2040_p1 = scmp.lt.u32.totalorder %s2036_s16, %s2170_s1 }
   0x4   :  { %p2042_p2 = pnand %p2040_p1, %p2037_p0 }
   0x6   :  { %2045 = shalt.err (!%p2042_p2)
}
   0x7   :  { %s2046_s21 = scalar_lea.vmem %s17_s13, 24576  ;;  %p2051_p4 = scmp.lt.s32.totalorder %s17_s13, %s17_s13 }
   0x8   :  { %p2047_p3 = scmp.ne.s32.totalorder %s17_s13, %s2046_s21  ;;  %p2052_p5 = scmp.lt.s32.totalorder %s2046_s21, %s2046_s21 }
   0xa   :  { %p2053_p6 = por %p2052_p5, %p2051_p4 }
   0xc   :  { %p2054_p7 = pnand %p2053_p6, %p2047_p3 }
   0xe   :  { %2057 = shalt.err (!%p2054_p7)
}
   0xf   :  { %s2061_s22 = smov 128   ;;  %s2062_s23 = smov 8  }
  0x10   :  { %22 = dma.hbm_to_vmem [thread:$0]  %s2170_s1, 24576, %s17_s13, [#allocation3], %s2061_s22, %s2061_s22, %s2062_s23  }
  0x11   :  { %2058 = dma.done.wait [#allocation3], 24576  }
  0x12   :  { %2059 = vsyncadd [#allocation3], 4294942720  ;;  %v1747_v0 = vld [vmem:[#allocation2 + $0x4] ss:$8 sps:$4 sm:$0xff]   ;;  %v1749_v1 = vld [vmem:[#allocation2] ss:$8 sps:$4 sm:$0xff]  }
  0x13   :  { %236 = vmatprep.subr.bf16.mxu0 %v1747_v0  ;;  %v1750_v2 = vld [vmem:[#allocation2 + $0x14] ss:$8 sps:$4 sm:$0xff]   ;;  %v1752_v3 = vld [vmem:[#allocation2 + $0x10] ss:$8 sps:$4 sm:$0xff]   ;;  %v1753_v4 = vld [vmem:[#allocation2 + $0x24] ss:$8 sps:$4 sm:$0xff]  }
  0x14   :  { %237 = vmatpush1.bf16.msra.mxu0 %v1749_v1  ;;  %v1755_v5 = vld [vmem:[#allocation2 + $0x20] ss:$8 sps:$4 sm:$0xff]   ;;  %v1756_v6 = vld [vmem:[#allocation2 + $0x34] ss:$8 sps:$4 sm:$0xff]   ;;  %v1758_v7 = vld [vmem:[#allocation2 + $0x30] ss:$8 sps:$4 sm:$0xff]  }
  0x15   :  { %238 = vmatprep.subr.bf16.mxu0 %v1750_v2  ;;  %v1759_v8 = vld [vmem:[#allocation2 + $0x44] ss:$8 sps:$4 sm:$0xff]   ;;  %v1761_v9 = vld [vmem:[#allocation2 + $0x40] ss:$8 sps:$4 sm:$0xff]   ;;  %v1762_v10 = vld [vmem:[#allocation2 + $0x54] ss:$8 sps:$4 sm:$0xff]  }
  0x16   :  { %v1764_v11 = vld [vmem:[#allocation2 + $0x50] ss:$8 sps:$4 sm:$0xff]   ;;  %v1765_v12 = vld [vmem:[#allocation2 + $0x64] ss:$8 sps:$4 sm:$0xff]   ;;  %v1767_v13 = vld [vmem:[#allocation2 + $0x60] ss:$8 sps:$4 sm:$0xff]  }
  0x17   :  { %v29_v14 = vld [vmem:[%s2169_s0 + $0x8] sm:$0xff]  ;;  %v1768_v18 = vld [vmem:[#allocation2 + $0x74] ss:$8 sps:$4 sm:$0xff]   ;;  %v1770_v20 = vld [vmem:[#allocation2 + $0x70] ss:$8 sps:$4 sm:$0xff]  }
  0x18   :  { %239 = vmatpush1.bf16.msra.mxu0 %v1752_v3  ;;  %v64_v15 = vpack.c.bf16 %v29_v14, %v29_v14  ;;  %v1795_v16 = vld [vmem:[#allocation2 + $0x104] ss:$8 sps:$4 sm:$0xff]   ;;  %v1797_v17 = vld [vmem:[#allocation2 + $0x100] ss:$8 sps:$4 sm:$0xff]   ;;  %v1798_v19 = vld [vmem:[#allocation2 + $0x114] ss:$8 sps:$4 sm:$0xff]  }
  0x19   :  { %240 = vmatprep.subr.bf16.mxu0 %v1753_v4  ;;  %487 = vmatprep.subr.bf16.mxu1 %v1795_v16  ;;  %v1800_v21 = vld [vmem:[#allocation2 + $0x110] ss:$8 sps:$4 sm:$0xff]   ;;  %v1801_v22 = vld [vmem:[#allocation2 + $0x124] ss:$8 sps:$4 sm:$0xff]   ;;  %v1773_v24 = vld [vmem:[#allocation2 + $0x80] ss:$8 sps:$4 sm:$0xff]  }
  0x1a   :  { %268 = vmatprep.mubr.bf16.mxu0 %v64_v15  ;;  %488 = vmatpush1.bf16.msra.mxu1 %v1797_v17  ;;  %v1771_v23 = vld [vmem:[#allocation2 + $0x84] ss:$8 sps:$4 sm:$0xff]   ;;  %v1803_v25 = vld [vmem:[#allocation2 + $0x120] ss:$8 sps:$4 sm:$0xff]   ;;  %v1804_v26 = vld [vmem:[#allocation2 + $0x134] ss:$8 sps:$4 sm:$0xff]  }
  0x1b   :  { %489 = vmatprep.subr.bf16.mxu1 %v1798_v19  ;;  %v1774_v27 = vld [vmem:[#allocation2 + $0x94] ss:$8 sps:$4 sm:$0xff]   ;;  %v1776_v28 = vld [vmem:[#allocation2 + $0x90] ss:$8 sps:$4 sm:$0xff]   ;;  %v1807_v30 = vld [vmem:[#allocation2 + $0x144] ss:$8 sps:$4 sm:$0xff]  }
  0x1c   :  { %241 = vmatpush1.bf16.msra.mxu0 %v1755_v5  ;;  %v1806_v29 = vld [vmem:[#allocation2 + $0x130] ss:$8 sps:$4 sm:$0xff]   ;;  %v1777_v31 = vld [vmem:[#allocation2 + $0xa4] ss:$8 sps:$4 sm:$0xff]   ;;  %v1779_v32 = vld [vmem:[#allocation2 + $0xa0] ss:$8 sps:$4 sm:$0xff]  }
  0x1d   :  { %242 = vmatprep.subr.bf16.mxu0 %v1756_v6  ;;  %v1809_v33 = vld [vmem:[#allocation2 + $0x140] ss:$8 sps:$4 sm:$0xff]   ;;  %v1810_v34 = vld [vmem:[#allocation2 + $0x154] ss:$8 sps:$4 sm:$0xff]   ;;  %v1812_v36 = vld [vmem:[#allocation2 + $0x150] ss:$8 sps:$4 sm:$0xff]  }
  0x1e   :  { %490 = vmatpush1.bf16.msra.mxu1 %v1800_v21  ;;  %v1780_v35 = vld [vmem:[#allocation2 + $0xb4] ss:$8 sps:$4 sm:$0xff]   ;;  %v1782_v37 = vld [vmem:[#allocation2 + $0xb0] ss:$8 sps:$4 sm:$0xff]   ;;  %v1813_v38 = vld [vmem:[#allocation2 + $0x164] ss:$8 sps:$4 sm:$0xff]  }
  0x1f   :  { %491 = vmatprep.subr.bf16.mxu1 %v1801_v22  ;;  %v1783_v39 = vld [vmem:[#allocation2 + $0xc4] ss:$8 sps:$4 sm:$0xff]   ;;  %v1815_v40 = vld [vmem:[#allocation2 + $0x160] ss:$8 sps:$4 sm:$0xff]   ;;  %v1816_v42 = vld [vmem:[#allocation2 + $0x174] ss:$8 sps:$4 sm:$0xff]  }
  0x20   :  { %243 = vmatpush1.bf16.msra.mxu0 %v1758_v7  ;;  %v1785_v41 = vld [vmem:[#allocation2 + $0xc0] ss:$8 sps:$4 sm:$0xff]   ;;  %v1786_v43 = vld [vmem:[#allocation2 + $0xd4] ss:$8 sps:$4 sm:$0xff]   ;;  %v1818_v44 = vld [vmem:[#allocation2 + $0x170] ss:$8 sps:$4 sm:$0xff]  }
  0x21   :  { %244 = vmatprep.subr.bf16.mxu0 %v1759_v8  ;;  %v1788_v45 = vld [vmem:[#allocation2 + $0xd0] ss:$8 sps:$4 sm:$0xff]   ;;  %v1819_v46 = vld [vmem:[#allocation2 + $0x184] ss:$8 sps:$4 sm:$0xff]   ;;  %v1821_v48 = vld [vmem:[#allocation2 + $0x180] ss:$8 sps:$4 sm:$0xff]  }
  0x22   :  { %492 = vmatpush1.bf16.msra.mxu1 %v1803_v25  ;;  %v1789_v47 = vld [vmem:[#allocation2 + $0xe4] ss:$8 sps:$4 sm:$0xff]   ;;  %v1791_v49 = vld [vmem:[#allocation2 + $0xe0] ss:$8 sps:$4 sm:$0xff]   ;;  %v1822_v50 = vld [vmem:[#allocation2 + $0x194] ss:$8 sps:$4 sm:$0xff]  }
  0x23   :  { %493 = vmatprep.subr.bf16.mxu1 %v1804_v26  ;;  %v1792_v51 = vld [vmem:[#allocation2 + $0xf4] ss:$8 sps:$4 sm:$0xff]   ;;  %v1824_v52 = vld [vmem:[#allocation2 + $0x190] ss:$8 sps:$4 sm:$0xff]   ;;  %v2101_v54 = vld [vmem:[%s2169_s0] sm:$0xff] }
  0x24   :  { %245 = vmatpush1.bf16.msra.mxu0 %v1761_v9  ;;  %v1794_v53 = vld [vmem:[#allocation2 + $0xf0] ss:$8 sps:$4 sm:$0xff]   ;;  %v1825_v55 = vld [vmem:[#allocation2 + $0x1a4] ss:$8 sps:$4 sm:$0xff]   ;;  %v1827_v56 = vld [vmem:[#allocation2 + $0x1a0] ss:$8 sps:$4 sm:$0xff]   ;;  %v63_v58 = vpack.c.bf16 %v2101_v54, %v2101_v54 }
  0x25   :  { %246 = vmatprep.subr.bf16.mxu0 %v1762_v10  ;;  %v1828_v57 = vld [vmem:[#allocation2 + $0x1b4] ss:$8 sps:$4 sm:$0xff]   ;;  %v1830_v59 = vld [vmem:[#allocation2 + $0x1b0] ss:$8 sps:$4 sm:$0xff]   ;;  %v1831_v60 = vld [vmem:[#allocation2 + $0x1c4] ss:$8 sps:$4 sm:$0xff]  }
  0x26   :  { %494 = vmatpush1.bf16.msra.mxu1 %v1806_v29  ;;  %v1833_v61 = vld [vmem:[#allocation2 + $0x1c0] ss:$8 sps:$4 sm:$0xff]   ;;  %v1834_v62 = vld [vmem:[#allocation2 + $0x1d4] ss:$8 sps:$4 sm:$0xff]   ;;  %v1836_v63 = vld [vmem:[#allocation2 + $0x1d0] ss:$8 sps:$4 sm:$0xff]  }
  0x27   :  { %495 = vmatprep.subr.bf16.mxu1 %v1807_v30  ;;  %v1837_v0 = vld [vmem:[#allocation2 + $0x1e4] ss:$8 sps:$4 sm:$0xff]   ;;  %v1839_v1 = vld [vmem:[#allocation2 + $0x1e0] ss:$8 sps:$4 sm:$0xff]   ;;  %v1840_v2 = vld [vmem:[#allocation2 + $0x1f4] ss:$8 sps:$4 sm:$0xff]  }
  0x28   :  { %247 = vmatpush1.bf16.msra.mxu0 %v1764_v11  ;;  %v1842_v3 = vld [vmem:[#allocation2 + $0x1f0] ss:$8 sps:$4 sm:$0xff]   ;;  %v1843_v4 = vld [vmem:[#allocation2 + $0x200] ss:$8 sps:$4 sm:$0xff]   ;;  %v1845_v5 = vld [vmem:[#allocation2 + $0x204] ss:$8 sps:$4 sm:$0xff]  }
  0x29   :  { %248 = vmatprep.subr.bf16.mxu0 %v1765_v12  ;;  %v1848_v6 = vld [vmem:[#allocation2 + $0x214] ss:$8 sps:$4 sm:$0xff]   ;;  %v1846_v7 = vld [vmem:[#allocation2 + $0x210] ss:$8 sps:$4 sm:$0xff]   ;;  %v1851_v8 = vld [vmem:[#allocation2 + $0x224] ss:$8 sps:$4 sm:$0xff]  }
  0x2a   :  { %496 = vmatpush1.bf16.msra.mxu1 %v1809_v33  ;;  %v1849_v9 = vld [vmem:[#allocation2 + $0x220] ss:$8 sps:$4 sm:$0xff]   ;;  %v1854_v10 = vld [vmem:[#allocation2 + $0x234] ss:$8 sps:$4 sm:$0xff]   ;;  %v1852_v11 = vld [vmem:[#allocation2 + $0x230] ss:$8 sps:$4 sm:$0xff]  }
  0x2b   :  { %497 = vmatprep.subr.bf16.mxu1 %v1810_v34  ;;  %v1857_v12 = vld [vmem:[#allocation2 + $0x244] ss:$8 sps:$4 sm:$0xff]   ;;  %v1860_v14 = vld [vmem:[#allocation2 + $0x254] ss:$8 sps:$4 sm:$0xff]   ;;  %v1858_v15 = vld [vmem:[#allocation2 + $0x250] ss:$8 sps:$4 sm:$0xff]  }
  0x2c   :  { %249 = vmatpush1.bf16.msra.mxu0 %v1767_v13  ;;  %v1855_v13 = vld [vmem:[#allocation2 + $0x240] ss:$8 sps:$4 sm:$0xff]   ;;  %v1863_v16 = vld [vmem:[#allocation2 + $0x264] ss:$8 sps:$4 sm:$0xff]   ;;  %v1864_v19 = vld [vmem:[#allocation2 + $0x270] ss:$8 sps:$4 sm:$0xff]  }
  0x2d   :  { %250 = vmatprep.subr.bf16.mxu0 %v1768_v18  ;;  %v1861_v17 = vld [vmem:[#allocation2 + $0x260] ss:$8 sps:$4 sm:$0xff]   ;;  %v1866_v18 = vld [vmem:[#allocation2 + $0x274] ss:$8 sps:$4 sm:$0xff]  }
  0x2e   :  { %498 = vmatpush1.bf16.msra.mxu1 %v1812_v36  ;;  %v1867_v21 = vld [vmem:[#allocation2 + $0x280] ss:$8 sps:$4 sm:$0xff]   ;;  %v1872_v22 = vld [vmem:[#allocation2 + $0x294] ss:$8 sps:$4 sm:$0xff]  }
  0x2f   :  { %499 = vmatprep.subr.bf16.mxu1 %v1813_v38  ;;  %v1873_v25 = vld [vmem:[#allocation2 + $0x2a0] ss:$8 sps:$4 sm:$0xff]   ;;  %v1878_v26 = vld [vmem:[#allocation2 + $0x2b4] ss:$8 sps:$4 sm:$0xff]  }
  0x30   :  { %251 = vmatpush1.bf16.msra.mxu0 %v1770_v20  ;;  %v1869_v20 = vld [vmem:[#allocation2 + $0x284] ss:$8 sps:$4 sm:$0xff]   ;;  %v1879_v29 = vld [vmem:[#allocation2 + $0x2c0] ss:$8 sps:$4 sm:$0xff]   ;;  %v1884_v30 = vld [vmem:[#allocation2 + $0x2d4] ss:$8 sps:$4 sm:$0xff]  }
  0x31   :  { %252 = vmatprep.subr.bf16.mxu0 %v1771_v23  ;;  %v1870_v23 = vld [vmem:[#allocation2 + $0x290] ss:$8 sps:$4 sm:$0xff]  }
  0x32   :  { %500 = vmatpush1.bf16.msra.mxu1 %v1815_v40 }
  0x33   :  { %501 = vmatprep.subr.bf16.mxu1 %v1816_v42 }
  0x34   :  { %253 = vmatpush1.bf16.msra.mxu0 %v1773_v24  ;;  %v1875_v24 = vld [vmem:[#allocation2 + $0x2a4] ss:$8 sps:$4 sm:$0xff]  }
  0x35   :  { %254 = vmatprep.subr.bf16.mxu0 %v1774_v27  ;;  %v1876_v27 = vld [vmem:[#allocation2 + $0x2b0] ss:$8 sps:$4 sm:$0xff]  }
  0x36   :  { %502 = vmatpush1.bf16.msra.mxu1 %v1818_v44 }
  0x37   :  { %503 = vmatprep.subr.bf16.mxu1 %v1819_v46 }
  0x38   :  { %255 = vmatpush1.bf16.msra.mxu0 %v1776_v28  ;;  %v1881_v28 = vld [vmem:[#allocation2 + $0x2c4] ss:$8 sps:$4 sm:$0xff]  }
  0x39   :  { %256 = vmatprep.subr.bf16.mxu0 %v1777_v31  ;;  %v1882_v31 = vld [vmem:[#allocation2 + $0x2d0] ss:$8 sps:$4 sm:$0xff]  }
  0x3a   :  { %504 = vmatpush1.bf16.msra.mxu1 %v1821_v48 }
  0x3b   :  { %505 = vmatprep.subr.bf16.mxu1 %v1822_v50  ;;  %v1885_v50 = vld [vmem:[#allocation2 + $0x2e0] ss:$8 sps:$4 sm:$0xff]  }
  0x3c   :  { %257 = vmatpush1.bf16.msra.mxu0 %v1779_v32  ;;  %v66_v32 = vlaneseq }
  0x3d   :  { %258 = vmatprep.subr.bf16.mxu0 %v1780_v35  ;;  %v62_v35 = vld [vmem:[%s2171_s2] sm:$0x3] }
  0x3e   :  { %506 = vmatpush1.bf16.msra.mxu1 %v1824_v52  ;;  %v67_v33 = vshrl.u32 %v66_v32, 7  ;;  %v1888_v52 = vld [vmem:[#allocation2 + $0x2f0] ss:$8 sps:$4 sm:$0xff]   ;;  %v1933_v32 = vld [vmem:[#allocation2 + $0x3e0] ss:$8 sps:$4 sm:$0xff]  }
  0x3f   :  { %507 = vmatprep.subr.bf16.mxu1 %v1825_v55  ;;  %v1893_v55 = vld [vmem:[#allocation2 + $0x304] ss:$8 sps:$4 sm:$0xff]  }
  0x40   :  { %259 = vmatpush1.bf16.msra.mxu0 %v1782_v37  ;;  %v2105_v34 = vsub.s32 0, %v67_v33  ;;  %v2110_v36 = vsub.s32 1, %v67_v33  ;;  %v1938_v33 = vld [vmem:[#allocation2 + $0x3f4] ss:$8 sps:$4 sm:$0xff]  }
  0x41   :  { %260 = vmatprep.subr.bf16.mxu0 %v1783_v39 }
  0x42   :  { %508 = vmatpush1.bf16.msra.mxu1 %v1827_v56  ;;  %v69_v37 = vrot.slane %v62_v35, %v2105_v34  ;;  %v73_v38 = vrot.slane %v62_v35, %v2110_v36  ;;  %v1896_v56 = vld [vmem:[#allocation2 + $0x314] ss:$8 sps:$4 sm:$0xff]   ;;  %v1936_v35 = vld [vmem:[#allocation2 + $0x3f0] ss:$8 sps:$4 sm:$0xff]  }
  0x43   :  { %509 = vmatprep.subr.bf16.mxu1 %v1828_v57  ;;  %v1894_v57 = vld [vmem:[#allocation2 + $0x310] ss:$8 sps:$4 sm:$0xff]  }
  0x44   :  { %261 = vmatpush1.bf16.msra.mxu0 %v1785_v41 }
  0x45   :  { %262 = vmatprep.subr.bf16.mxu0 %v1786_v43 }
  0x46   :  { %510 = vmatpush1.bf16.msra.mxu1 %v1830_v59  ;;  %v1897_v59 = vld [vmem:[#allocation2 + $0x320] ss:$8 sps:$4 sm:$0xff]  }
  0x47   :  { %511 = vmatprep.subr.bf16.mxu1 %v1831_v60  ;;  %v1902_v60 = vld [vmem:[#allocation2 + $0x334] ss:$8 sps:$4 sm:$0xff]  }
  0x48   :  { %263 = vmatpush1.bf16.msra.mxu0 %v1788_v45 }
  0x49   :  { %264 = vmatprep.subr.bf16.mxu0 %v1789_v47 }
  0x4a   :  { %512 = vmatpush1.bf16.msra.mxu1 %v1833_v61  ;;  %v1900_v61 = vld [vmem:[#allocation2 + $0x330] ss:$8 sps:$4 sm:$0xff]  }
  0x4b   :  { %513 = vmatprep.subr.bf16.mxu1 %v1834_v62  ;;  %v1905_v62 = vld [vmem:[#allocation2 + $0x344] ss:$8 sps:$4 sm:$0xff]  }
  0x4c   :  { %265 = vmatpush1.bf16.msra.mxu0 %v1791_v49  ;;  %v1887_v49 = vld [vmem:[#allocation2 + $0x2e4] ss:$8 sps:$4 sm:$0xff]  }
  0x4d   :  { %266 = vmatprep.subr.bf16.mxu0 %v1792_v51  ;;  %v1890_v51 = vld [vmem:[#allocation2 + $0x2f4] ss:$8 sps:$4 sm:$0xff]  }
  0x4e   :  { %514 = vmatpush1.bf16.msra.mxu1 %v1836_v63  ;;  %v1903_v63 = vld [vmem:[#allocation2 + $0x340] ss:$8 sps:$4 sm:$0xff]  }
  0x4f   :  { %515 = vmatprep.subr.bf16.mxu1 %v1837_v0  ;;  %v1908_v0 = vld [vmem:[#allocation2 + $0x354] ss:$8 sps:$4 sm:$0xff]  }
  0x50   :  { %267 = vmatpush1.bf16.msra.mxu0 %v1794_v53  ;;  %v1891_v53 = vld [vmem:[#allocation2 + $0x300] ss:$8 sps:$4 sm:$0xff]  }
  0x51   :  { %738 = vmatprep.subr.bf16.mxu0 %v1845_v5  ;;  %v1912_v5 = vld [vmem:[#allocation2 + $0x370] ss:$8 sps:$4 sm:$0xff]  }
  0x52   :  { %516 = vmatpush1.bf16.msra.mxu1 %v1839_v1  ;;  %v1906_v1 = vld [vmem:[#allocation2 + $0x350] ss:$8 sps:$4 sm:$0xff]  }
  0x53   :  { %269 = vmatmul.mubr.bf16.vlgmr.msra.gmra.mrb[0].mxu0 %v63_v58  ;;  %517 = vmatprep.subr.bf16.mxu1 %v1840_v2  ;;  %v1899_v58 = vld [vmem:[#allocation2 + $0x324] ss:$8 sps:$4 sm:$0xff]  }
  0x54   :  { %739 = vmatpush1.bf16.msra.mxu0 %v1843_v4  ;;  %v1911_v2 = vld [vmem:[#allocation2 + $0x364] ss:$8 sps:$4 sm:$0xff]   ;;  %v1914_v4 = vld [vmem:[#allocation2 + $0x374] ss:$8 sps:$4 sm:$0xff]  }
  0x55   :  { %740 = vmatprep.subr.bf16.mxu0 %v1848_v6  ;;  %v1917_v6 = vld [vmem:[#allocation2 + $0x384] ss:$8 sps:$4 sm:$0xff]  }
  0x56   :  { %518 = vmatpush1.bf16.msra.mxu1 %v1842_v3  ;;  %v1909_v3 = vld [vmem:[#allocation2 + $0x360] ss:$8 sps:$4 sm:$0xff]  }
  0x57   :  { %989 = vmatprep.subr.bf16.mxu1 %v1893_v55  ;;  %v1960_v55 = vld [vmem:[#allocation2 + $0x470] ss:$8 sps:$4 sm:$0xff]  }
  0x58   :  { %741 = vmatpush1.bf16.msra.mxu0 %v1846_v7  ;;  %v1915_v7 = vld [vmem:[#allocation2 + $0x380] ss:$8 sps:$4 sm:$0xff]  }
  0x59   :  { %742 = vmatprep.subr.bf16.mxu0 %v1851_v8  ;;  %v1920_v8 = vld [vmem:[#allocation2 + $0x394] ss:$8 sps:$4 sm:$0xff]  }
  0x5c   :  { %743 = vmatpush1.bf16.msra.mxu0 %v1849_v9  ;;  %v1918_v9 = vld [vmem:[#allocation2 + $0x390] ss:$8 sps:$4 sm:$0xff]  }
  0x5d   :  { %744 = vmatprep.subr.bf16.mxu0 %v1854_v10  ;;  %v1923_v10 = vld [vmem:[#allocation2 + $0x3a4] ss:$8 sps:$4 sm:$0xff]  }
  0x60   :  { %745 = vmatpush1.bf16.msra.mxu0 %v1852_v11  ;;  %v1921_v11 = vld [vmem:[#allocation2 + $0x3a0] ss:$8 sps:$4 sm:$0xff]  }
  0x61   :  { %746 = vmatprep.subr.bf16.mxu0 %v1857_v12  ;;  %v1926_v12 = vld [vmem:[#allocation2 + $0x3b4] ss:$8 sps:$4 sm:$0xff]  }
  0x64   :  { %747 = vmatpush1.bf16.msra.mxu0 %v1855_v13  ;;  %v1924_v13 = vld [vmem:[#allocation2 + $0x3b0] ss:$8 sps:$4 sm:$0xff]  }
  0x65   :  { %748 = vmatprep.subr.bf16.mxu0 %v1860_v14  ;;  %v1929_v14 = vld [vmem:[#allocation2 + $0x3c4] ss:$8 sps:$4 sm:$0xff]  }
  0x68   :  { %749 = vmatpush1.bf16.msra.mxu0 %v1858_v15  ;;  %v1927_v15 = vld [vmem:[#allocation2 + $0x3c0] ss:$8 sps:$4 sm:$0xff]  }
  0x69   :  { %750 = vmatprep.subr.bf16.mxu0 %v1863_v16  ;;  %v1932_v16 = vld [vmem:[#allocation2 + $0x3d4] ss:$8 sps:$4 sm:$0xff]  }
  0x6c   :  { %751 = vmatpush1.bf16.msra.mxu0 %v1861_v17  ;;  %v1930_v17 = vld [vmem:[#allocation2 + $0x3d0] ss:$8 sps:$4 sm:$0xff]  }
  0x6d   :  { %752 = vmatprep.subr.bf16.mxu0 %v1866_v18  ;;  %v1579_v18 = vld [vmem:[%s2171_s2 + $0x2] sm:$0x3] }
  0x70   :  { %753 = vmatpush1.bf16.msra.mxu0 %v1864_v19  ;;  %v320_v19 = vrot.slane %v1579_v18, %v2105_v34 }
  0x71   :  { %754 = vmatprep.subr.bf16.mxu0 %v1869_v20  ;;  %v324_v20 = vrot.slane %v1579_v18, %v2110_v36  ;;  %v1981_v18 = vld [vmem:[#allocation2 + $0x4e0] ss:$8 sps:$4 sm:$0xff]  }
  0x74   :  { %755 = vmatpush1.bf16.msra.mxu0 %v1867_v21 }
  0x75   :  { %756 = vmatprep.subr.bf16.mxu0 %v1872_v22 }
  0x78   :  { %757 = vmatpush1.bf16.msra.mxu0 %v1870_v23 }
  0x79   :  { %758 = vmatprep.subr.bf16.mxu0 %v1875_v24 }
  0x7c   :  { %759 = vmatpush1.bf16.msra.mxu0 %v1873_v25 }
  0x7d   :  { %760 = vmatprep.subr.bf16.mxu0 %v1878_v26 }
  0x80   :  { %761 = vmatpush1.bf16.msra.mxu0 %v1876_v27 }
  0x81   :  { %762 = vmatprep.subr.bf16.mxu0 %v1881_v28 }
  0x84   :  { %763 = vmatpush1.bf16.msra.mxu0 %v1879_v29 }
  0x85   :  { %764 = vmatprep.subr.bf16.mxu0 %v1884_v30 }
  0x88   :  { %765 = vmatpush1.bf16.msra.mxu0 %v1882_v31  ;;  %v1935_v31 = vld [vmem:[#allocation2 + $0x3e4] ss:$8 sps:$4 sm:$0xff]  }
  0x89   :  { %766 = vmatprep.subr.bf16.mxu0 %v1887_v49  ;;  %v1956_v49 = vld [vmem:[#allocation2 + $0x454] ss:$8 sps:$4 sm:$0xff]  }
  0x8c   :  { %767 = vmatpush1.bf16.msra.mxu0 %v1885_v50  ;;  %v1954_v50 = vld [vmem:[#allocation2 + $0x450] ss:$8 sps:$4 sm:$0xff]  }
  0x8d   :  { %768 = vmatprep.subr.bf16.mxu0 %v1890_v51  ;;  %v1959_v51 = vld [vmem:[#allocation2 + $0x464] ss:$8 sps:$4 sm:$0xff]  }
  0x90   :  { %769 = vmatpush1.bf16.msra.mxu0 %v1888_v52  ;;  %v1957_v52 = vld [vmem:[#allocation2 + $0x460] ss:$8 sps:$4 sm:$0xff]  }
 0x126   :  { %v270_v39 = vpop.f32.mrb[0].mxu0 }
 0x127   :  { %v271_v40 = vadd.f32 %v270_v39, %v69_v37  ;;  %v272_v41 = vpop.f32.mrb[1].mxu0  ;;  %v1939_v37 = vld [vmem:[#allocation2 + $0x400] ss:$8 sps:$4 sm:$0xff]   ;;  %v1944_v39 = vld [vmem:[#allocation2 + $0x414] ss:$8 sps:$4 sm:$0xff]  }
 0x128   :  { %v273_v42 = vadd.f32 %v272_v41, %v73_v38  ;;  %v274_v43 = vpop.f32.mrb[2].mxu0  ;;  %v1941_v38 = vld [vmem:[#allocation2 + $0x404] ss:$8 sps:$4 sm:$0xff]  }
 0x129   :  { %v2114_v44 = vmax.f32 %v271_v40, 0.0  ;;  %v275_v45 = vpop.f32.mrb[3].mxu0  ;;  %1242 = vmatprep.subr.bf16.mxu0 %v1941_v38  ;;  %v1942_v40 = vld [vmem:[#allocation2 + $0x410] ss:$8 sps:$4 sm:$0xff]   ;;  %v1947_v41 = vld [vmem:[#allocation2 + $0x424] ss:$8 sps:$4 sm:$0xff]  }
 0x12a   :  { %v2116_v46 = vmax.f32 %v273_v42, 0.0  ;;  %v1945_v42 = vld [vmem:[#allocation2 + $0x420] ss:$8 sps:$4 sm:$0xff]   ;;  %v1950_v43 = vld [vmem:[#allocation2 + $0x434] ss:$8 sps:$4 sm:$0xff]  }
 0x12b   :  { %v314_v48 = vpack.c.bf16 %v2114_v44, %v2114_v44  ;;  %v1948_v45 = vld [vmem:[#allocation2 + $0x430] ss:$8 sps:$4 sm:$0xff]   ;;  %v2005_v38 = vld [vmem:[#allocation2 + $0x560] ss:$8 sps:$4 sm:$0xff]  }
 0x12c   :  { %v315_v47 = vpack.c.bf16 %v2116_v46, %v2116_v46 }
 0x12e   :  { %519 = vmatprep.mubr.bf16.mxu1 %v315_v47  ;;  %v1953_v47 = vld [vmem:[#allocation2 + $0x444] ss:$8 sps:$4 sm:$0xff]  }
 0x12f   :  { %520 = vmatmul.mubr.bf16.vlgmr.msra.gmra.mrb[0].mxu1 %v314_v48  ;;  %v1951_v48 = vld [vmem:[#allocation2 + $0x440] ss:$8 sps:$4 sm:$0xff]  }
 0x130   :  { %990 = vmatpush1.bf16.msra.mxu1 %v1891_v53  ;;  %v1962_v53 = vld [vmem:[#allocation2 + $0x474] ss:$8 sps:$4 sm:$0xff]  }
 0x131   :  { %991 = vmatprep.subr.bf16.mxu1 %v1896_v56  ;;  %v1965_v56 = vld [vmem:[#allocation2 + $0x484] ss:$8 sps:$4 sm:$0xff]  }
 0x134   :  { %992 = vmatpush1.bf16.msra.mxu1 %v1894_v57  ;;  %v1963_v57 = vld [vmem:[#allocation2 + $0x480] ss:$8 sps:$4 sm:$0xff]  }
 0x135   :  { %993 = vmatprep.subr.bf16.mxu1 %v1899_v58  ;;  %v1968_v58 = vld [vmem:[#allocation2 + $0x494] ss:$8 sps:$4 sm:$0xff]  }
 0x138   :  { %994 = vmatpush1.bf16.msra.mxu1 %v1897_v59  ;;  %v1966_v59 = vld [vmem:[#allocation2 + $0x490] ss:$8 sps:$4 sm:$0xff]  }
 0x139   :  { %995 = vmatprep.subr.bf16.mxu1 %v1902_v60  ;;  %v1971_v60 = vld [vmem:[#allocation2 + $0x4a4] ss:$8 sps:$4 sm:$0xff]  }
 0x13c   :  { %996 = vmatpush1.bf16.msra.mxu1 %v1900_v61  ;;  %v1969_v61 = vld [vmem:[#allocation2 + $0x4a0] ss:$8 sps:$4 sm:$0xff]  }
 0x13d   :  { %997 = vmatprep.subr.bf16.mxu1 %v1905_v62  ;;  %v1974_v62 = vld [vmem:[#allocation2 + $0x4b4] ss:$8 sps:$4 sm:$0xff]  }
 0x140   :  { %998 = vmatpush1.bf16.msra.mxu1 %v1903_v63  ;;  %v1972_v63 = vld [vmem:[#allocation2 + $0x4b0] ss:$8 sps:$4 sm:$0xff]  }
 0x141   :  { %999 = vmatprep.subr.bf16.mxu1 %v1908_v0  ;;  %v1977_v0 = vld [vmem:[#allocation2 + $0x4c4] ss:$8 sps:$4 sm:$0xff]  }
 0x144   :  { %1000 = vmatpush1.bf16.msra.mxu1 %v1906_v1  ;;  %v1975_v1 = vld [vmem:[#allocation2 + $0x4c0] ss:$8 sps:$4 sm:$0xff]  }
 0x145   :  { %1001 = vmatprep.subr.bf16.mxu1 %v1911_v2  ;;  %v1980_v2 = vld [vmem:[#allocation2 + $0x4d4] ss:$8 sps:$4 sm:$0xff]  }
 0x148   :  { %1002 = vmatpush1.bf16.msra.mxu1 %v1909_v3  ;;  %v1978_v3 = vld [vmem:[#allocation2 + $0x4d0] ss:$8 sps:$4 sm:$0xff]  }
 0x149   :  { %1003 = vmatprep.subr.bf16.mxu1 %v1914_v4  ;;  %v1612_v4 = vld [vmem:[%s2171_s2 + $0x4] sm:$0x3] }
 0x14c   :  { %1004 = vmatpush1.bf16.msra.mxu1 %v1912_v5  ;;  %v571_v5 = vrot.slane %v1612_v4, %v2105_v34 }
 0x14d   :  { %1005 = vmatprep.subr.bf16.mxu1 %v1917_v6  ;;  %v575_v6 = vrot.slane %v1612_v4, %v2110_v36 }
 0x150   :  { %1006 = vmatpush1.bf16.msra.mxu1 %v1915_v7 }
 0x151   :  { %1007 = vmatprep.subr.bf16.mxu1 %v1920_v8 }
 0x154   :  { %1008 = vmatpush1.bf16.msra.mxu1 %v1918_v9 }
 0x155   :  { %1009 = vmatprep.subr.bf16.mxu1 %v1923_v10 }
 0x158   :  { %1010 = vmatpush1.bf16.msra.mxu1 %v1921_v11 }
 0x159   :  { %1011 = vmatprep.subr.bf16.mxu1 %v1926_v12 }
 0x15c   :  { %1012 = vmatpush1.bf16.msra.mxu1 %v1924_v13 }
 0x15d   :  { %1013 = vmatprep.subr.bf16.mxu1 %v1929_v14 }
 0x160   :  { %1014 = vmatpush1.bf16.msra.mxu1 %v1927_v15 }
 0x161   :  { %1015 = vmatprep.subr.bf16.mxu1 %v1932_v16 }
 0x164   :  { %1016 = vmatpush1.bf16.msra.mxu1 %v1930_v17  ;;  %v1983_v17 = vld [vmem:[#allocation2 + $0x4e4] ss:$8 sps:$4 sm:$0xff]  }
 0x165   :  { %1017 = vmatprep.subr.bf16.mxu1 %v1935_v31  ;;  %v2001_v31 = vld [vmem:[#allocation2 + $0x544] ss:$8 sps:$4 sm:$0xff]  }
 0x168   :  { %1018 = vmatpush1.bf16.msra.mxu1 %v1933_v32  ;;  %v1999_v32 = vld [vmem:[#allocation2 + $0x540] ss:$8 sps:$4 sm:$0xff]  }
 0x169   :  { %1019 = vmatprep.subr.bf16.mxu1 %v1938_v33  ;;  %v2004_v33 = vld [vmem:[#allocation2 + $0x554] ss:$8 sps:$4 sm:$0xff]  }
 0x16c   :  { %1020 = vmatpush1.bf16.msra.mxu1 %v1936_v35  ;;  %v2002_v35 = vld [vmem:[#allocation2 + $0x550] ss:$8 sps:$4 sm:$0xff]  }
 0x202   :  { %v521_v21 = vpop.f32.mrb[0].mxu1 }
 0x203   :  { %v522_v22 = vadd.f32 %v521_v21, %v320_v19  ;;  %v523_v23 = vpop.f32.mrb[1].mxu1  ;;  %v1986_v19 = vld [vmem:[#allocation2 + $0x4f4] ss:$8 sps:$4 sm:$0xff]   ;;  %v1987_v21 = vld [vmem:[#allocation2 + $0x500] ss:$8 sps:$4 sm:$0xff]  }
 0x204   :  { %v524_v24 = vadd.f32 %v523_v23, %v324_v20  ;;  %v525_v25 = vpop.f32.mrb[2].mxu1  ;;  %v1984_v20 = vld [vmem:[#allocation2 + $0x4f0] ss:$8 sps:$4 sm:$0xff]   ;;  %v1992_v23 = vld [vmem:[#allocation2 + $0x514] ss:$8 sps:$4 sm:$0xff]  }
 0x205   :  { %v2127_v26 = vmax.f32 %v522_v22, 0.0  ;;  %v526_v27 = vpop.f32.mrb[3].mxu1  ;;  %v1989_v22 = vld [vmem:[#allocation2 + $0x504] ss:$8 sps:$4 sm:$0xff]  }
 0x206   :  { %v2129_v28 = vmax.f32 %v524_v24, 0.0  ;;  %1495 = vmatprep.subr.bf16.mxu1 %v1989_v22  ;;  %v1990_v24 = vld [vmem:[#allocation2 + $0x510] ss:$8 sps:$4 sm:$0xff]   ;;  %v1995_v25 = vld [vmem:[#allocation2 + $0x524] ss:$8 sps:$4 sm:$0xff]  }
 0x207   :  { %v565_v30 = vpack.c.bf16 %v2127_v26, %v2127_v26  ;;  %v1993_v27 = vld [vmem:[#allocation2 + $0x520] ss:$8 sps:$4 sm:$0xff]  }
 0x208   :  { %v566_v29 = vpack.c.bf16 %v2129_v28, %v2129_v28 }
 0x20a   :  { %770 = vmatprep.mubr.bf16.mxu0 %v566_v29  ;;  %v1998_v29 = vld [vmem:[#allocation2 + $0x534] ss:$8 sps:$4 sm:$0xff]  }
 0x20b   :  { %771 = vmatmul.mubr.bf16.vlgmr.msra.gmra.mrb[4].mxu0 %v565_v30  ;;  %v1996_v30 = vld [vmem:[#allocation2 + $0x530] ss:$8 sps:$4 sm:$0xff]  }
 0x20c   :  { %1243 = vmatpush1.bf16.msra.mxu0 %v1939_v37  ;;  %v2007_v37 = vld [vmem:[#allocation2 + $0x564] ss:$8 sps:$4 sm:$0xff]  }
 0x20d   :  { %1244 = vmatprep.subr.bf16.mxu0 %v1944_v39  ;;  %v2010_v39 = vld [vmem:[#allocation2 + $0x574] ss:$8 sps:$4 sm:$0xff]  }
 0x210   :  { %1245 = vmatpush1.bf16.msra.mxu0 %v1942_v40  ;;  %v2008_v40 = vld [vmem:[#allocation2 + $0x570] ss:$8 sps:$4 sm:$0xff]  }
 0x211   :  { %1246 = vmatprep.subr.bf16.mxu0 %v1947_v41  ;;  %v2013_v41 = vld [vmem:[#allocation2 + $0x584] ss:$8 sps:$4 sm:$0xff]  }
 0x214   :  { %1247 = vmatpush1.bf16.msra.mxu0 %v1945_v42  ;;  %v2011_v42 = vld [vmem:[#allocation2 + $0x580] ss:$8 sps:$4 sm:$0xff]  }
 0x215   :  { %1248 = vmatprep.subr.bf16.mxu0 %v1950_v43  ;;  %v2016_v43 = vld [vmem:[#allocation2 + $0x594] ss:$8 sps:$4 sm:$0xff]  }
 0x218   :  { %1249 = vmatpush1.bf16.msra.mxu0 %v1948_v45  ;;  %v2014_v45 = vld [vmem:[#allocation2 + $0x590] ss:$8 sps:$4 sm:$0xff]  }
 0x219   :  { %1250 = vmatprep.subr.bf16.mxu0 %v1953_v47  ;;  %v2019_v47 = vld [vmem:[#allocation2 + $0x5a4] ss:$8 sps:$4 sm:$0xff]  }
 0x21c   :  { %1251 = vmatpush1.bf16.msra.mxu0 %v1951_v48  ;;  %v2017_v48 = vld [vmem:[#allocation2 + $0x5a0] ss:$8 sps:$4 sm:$0xff]  }
 0x21d   :  { %1252 = vmatprep.subr.bf16.mxu0 %v1956_v49  ;;  %v2022_v49 = vld [vmem:[#allocation2 + $0x5b4] ss:$8 sps:$4 sm:$0xff]  }
 0x220   :  { %1253 = vmatpush1.bf16.msra.mxu0 %v1954_v50  ;;  %v2020_v50 = vld [vmem:[#allocation2 + $0x5b0] ss:$8 sps:$4 sm:$0xff]  }
 0x221   :  { %1254 = vmatprep.subr.bf16.mxu0 %v1959_v51  ;;  %v2025_v51 = vld [vmem:[#allocation2 + $0x5c4] ss:$8 sps:$4 sm:$0xff]  }
 0x224   :  { %1255 = vmatpush1.bf16.msra.mxu0 %v1957_v52  ;;  %v2023_v52 = vld [vmem:[#allocation2 + $0x5c0] ss:$8 sps:$4 sm:$0xff]  }
 0x225   :  { %1256 = vmatprep.subr.bf16.mxu0 %v1962_v53  ;;  %v2028_v53 = vld [vmem:[#allocation2 + $0x5d4] ss:$8 sps:$4 sm:$0xff]  }
 0x228   :  { %1257 = vmatpush1.bf16.msra.mxu0 %v1960_v55  ;;  %v2026_v55 = vld [vmem:[#allocation2 + $0x5d0] ss:$8 sps:$4 sm:$0xff]  }
 0x229   :  { %1258 = vmatprep.subr.bf16.mxu0 %v1965_v56  ;;  %v1645_v56 = vld [vmem:[%s2171_s2 + $0x6] sm:$0x3] }
 0x22c   :  { %1259 = vmatpush1.bf16.msra.mxu0 %v1963_v57  ;;  %v822_v57 = vrot.slane %v1645_v56, %v2105_v34 }
 0x22d   :  { %1260 = vmatprep.subr.bf16.mxu0 %v1968_v58  ;;  %v826_v58 = vrot.slane %v1645_v56, %v2110_v36 }
 0x230   :  { %1261 = vmatpush1.bf16.msra.mxu0 %v1966_v59 }
 0x231   :  { %1262 = vmatprep.subr.bf16.mxu0 %v1971_v60 }
 0x234   :  { %1263 = vmatpush1.bf16.msra.mxu0 %v1969_v61 }
 0x235   :  { %1264 = vmatprep.subr.bf16.mxu0 %v1974_v62 }
 0x238   :  { %1265 = vmatpush1.bf16.msra.mxu0 %v1972_v63 }
 0x239   :  { %1266 = vmatprep.subr.bf16.mxu0 %v1977_v0 }
 0x23c   :  { %1267 = vmatpush1.bf16.msra.mxu0 %v1975_v1 }
 0x23d   :  { %1268 = vmatprep.subr.bf16.mxu0 %v1980_v2 }
 0x240   :  { %1269 = vmatpush1.bf16.msra.mxu0 %v1978_v3 }
 0x241   :  { %1270 = vmatprep.subr.bf16.mxu0 %v1983_v17 }
 0x244   :  { %1271 = vmatpush1.bf16.msra.mxu0 %v1981_v18 }
 0x245   :  { %1272 = vmatprep.subr.bf16.mxu0 %v1986_v19 }
 0x248   :  { %1273 = vmatpush1.bf16.msra.mxu0 %v1984_v20 }
 0x2de   :  { %v772_v7 = vpop.f32.mrb[4].mxu0 }
 0x2df   :  { %v773_v8 = vadd.f32 %v772_v7, %v571_v5  ;;  %v774_v9 = vpop.f32.mrb[5].mxu0  ;;  %v2031_v7 = vld [vmem:[#allocation2 + $0x5e4] ss:$8 sps:$4 sm:$0xff]  }
 0x2e0   :  { %v775_v10 = vadd.f32 %v774_v9, %v575_v6  ;;  %v776_v11 = vpop.f32.mrb[6].mxu0  ;;  %v2034_v9 = vld [vmem:[#allocation2 + $0x5f4] ss:$8 sps:$4 sm:$0xff]  }
 0x2e1   :  { %v779_v12 = vmax.f32 %v773_v8, 0.0  ;;  %v777_v13 = vpop.f32.mrb[7].mxu0  ;;  %v2029_v8 = vld [vmem:[#allocation2 + $0x5e0] ss:$8 sps:$4 sm:$0xff]  }
 0x2e2   :  { %v780_v14 = vmax.f32 %v775_v10, 0.0  ;;  %v2032_v10 = vld [vmem:[#allocation2 + $0x5f0] ss:$8 sps:$4 sm:$0xff]   ;;  %v1678_v11 = vld [vmem:[%s2171_s2 + $0x8] sm:$0x3] }
 0x2e3   :  { %v816_v16 = vpack.c.bf16 %v779_v12, %v779_v12 }
 0x2e4   :  { %v817_v15 = vpack.c.bf16 %v780_v14, %v780_v14 }
 0x2e6   :  { %1021 = vmatprep.mubr.bf16.mxu1 %v817_v15 }
 0x2e7   :  { %1022 = vmatmul.mubr.bf16.vlgmr.msra.gmra.mrb[4].mxu1 %v816_v16 }
 0x2e8   :  { %1496 = vmatpush1.bf16.msra.mxu1 %v1987_v21 }
 0x2e9   :  { %1497 = vmatprep.subr.bf16.mxu1 %v1992_v23 }
 0x2ec   :  { %1498 = vmatpush1.bf16.msra.mxu1 %v1990_v24  ;;  %v1711_v24 = vld [vmem:[%s2171_s2 + $0xa] sm:$0x3] }
 0x2ed   :  { %1499 = vmatprep.subr.bf16.mxu1 %v1995_v25  ;;  %v1328_v25 = vrot.slane %v1711_v24, %v2105_v34 }
 0x2f0   :  { %1500 = vmatpush1.bf16.msra.mxu1 %v1993_v27  ;;  %v1332_v27 = vrot.slane %v1711_v24, %v2110_v36 }
 0x2f1   :  { %1501 = vmatprep.subr.bf16.mxu1 %v1998_v29 }
 0x2f4   :  { %1502 = vmatpush1.bf16.msra.mxu1 %v1996_v30 }
 0x2f5   :  { %1503 = vmatprep.subr.bf16.mxu1 %v2001_v31 }
 0x2f8   :  { %1504 = vmatpush1.bf16.msra.mxu1 %v1999_v32 }
 0x2f9   :  { %1505 = vmatprep.subr.bf16.mxu1 %v2004_v33 }
 0x2fc   :  { %1506 = vmatpush1.bf16.msra.mxu1 %v2002_v35 }
 0x2fd   :  { %1507 = vmatprep.subr.bf16.mxu1 %v2007_v37 }
 0x300   :  { %1508 = vmatpush1.bf16.msra.mxu1 %v2005_v38  ;;  %v2035_v38 = vld [vmem:[%s2169_s0 + $0x8] sm:$0xff] }
 0x301   :  { %1509 = vmatprep.subr.bf16.mxu1 %v2010_v39 }
 0x304   :  { %1510 = vmatpush1.bf16.msra.mxu1 %v2008_v40 }
 0x305   :  { %1511 = vmatprep.subr.bf16.mxu1 %v2013_v41 }
 0x308   :  { %1512 = vmatpush1.bf16.msra.mxu1 %v2011_v42 }
 0x309   :  { %1513 = vmatprep.subr.bf16.mxu1 %v2016_v43 }
 0x30c   :  { %1514 = vmatpush1.bf16.msra.mxu1 %v2014_v45 }
 0x30d   :  { %1515 = vmatprep.subr.bf16.mxu1 %v2019_v47 }
 0x310   :  { %1516 = vmatpush1.bf16.msra.mxu1 %v2017_v48 }
 0x311   :  { %1517 = vmatprep.subr.bf16.mxu1 %v2022_v49 }
 0x314   :  { %1518 = vmatpush1.bf16.msra.mxu1 %v2020_v50 }
 0x315   :  { %1519 = vmatprep.subr.bf16.mxu1 %v2025_v51 }
 0x318   :  { %1520 = vmatpush1.bf16.msra.mxu1 %v2023_v52 }
 0x319   :  { %1521 = vmatprep.subr.bf16.mxu1 %v2028_v53 }
 0x31c   :  { %1522 = vmatpush1.bf16.msra.mxu1 %v2026_v55 }
 0x31d   :  { %1523 = vmatprep.subr.bf16.mxu1 %v2031_v7 }
 0x320   :  { %1524 = vmatpush1.bf16.msra.mxu1 %v2029_v8 }
 0x321   :  { %1525 = vmatprep.subr.bf16.mxu1 %v2034_v9 }
 0x324   :  { %1526 = vmatpush1.bf16.msra.mxu1 %v2032_v10 }
 0x3ba   :  { %v1023_v59 = vpop.f32.mrb[4].mxu1 }
 0x3bb   :  { %v1024_v60 = vadd.f32 %v1023_v59, %v822_v57  ;;  %v1025_v61 = vpop.f32.mrb[5].mxu1 }
 0x3bc   :  { %v1026_v62 = vadd.f32 %v1025_v61, %v826_v58  ;;  %v1027_v63 = vpop.f32.mrb[6].mxu1 }
 0x3bd   :  { %v1030_v0 = vmax.f32 %v1024_v60, 0.0  ;;  %v1028_v1 = vpop.f32.mrb[7].mxu1 }
 0x3be   :  { %v1031_v2 = vmax.f32 %v1026_v62, 0.0 }
 0x3bf   :  { %v1032_v3 = vadd.f32 %v1030_v0, %v2127_v26  ;;  %v1075_v26 = vrot.slane %v1678_v11, %v2105_v34 }
 0x3c0   :  { %v1033_v4 = vadd.f32 %v1031_v2, %v2129_v28  ;;  %v1079_v28 = vrot.slane %v1678_v11, %v2110_v36 }
 0x3c1   :  { %v1069_v6 = vpack.c.bf16 %v1032_v3, %v1032_v3 }
 0x3c2   :  { %v1070_v5 = vpack.c.bf16 %v1033_v4, %v1033_v4 }
 0x3c4   :  { %1274 = vmatprep.mubr.bf16.mxu0 %v1070_v5 }
 0x3c5   :  { %1275 = vmatmul.mubr.bf16.vlgmr.msra.gmra.mrb[8].mxu0 %v1069_v6 }
 0x498   :  { %v1276_v12 = vpop.f32.mrb[8].mxu0 }
 0x499   :  { %v1277_v13 = vadd.f32 %v1276_v12, %v1075_v26  ;;  %v1278_v14 = vpop.f32.mrb[9].mxu0 }
 0x49a   :  { %v1279_v15 = vadd.f32 %v1278_v14, %v1079_v28  ;;  %v1280_v16 = vpop.f32.mrb[10].mxu0 }
 0x49b   :  { %v1283_v17 = vmax.f32 %v1277_v13, 0.0  ;;  %v1281_v18 = vpop.f32.mrb[11].mxu0 }
 0x49c   :  { %v1284_v19 = vmax.f32 %v1279_v15, 0.0 }
 0x49d   :  { %v1285_v20 = vadd.f32 %v1283_v17, %v2114_v44 }
 0x49e   :  { %v1286_v21 = vadd.f32 %v1284_v19, %v2116_v46 }
 0x49f   :  { %v1322_v23 = vpack.c.bf16 %v1285_v20, %v1285_v20 }
 0x4a0   :  { %v1323_v22 = vpack.c.bf16 %v1286_v21, %v1286_v21 }
 0x4a2   :  { %1527 = vmatprep.mubr.bf16.mxu1 %v1323_v22 }
 0x4a3   :  { %1528 = vmatmul.mubr.bf16.vlgmr.msra.gmra.mrb[8].mxu1 %v1322_v23 }
 0x576   :  { %v1529_v29 = vpop.f32.mrb[8].mxu1 }
 0x577   :  { %v1530_v30 = vadd.f32 %v1529_v29, %v1328_v25  ;;  %v1531_v31 = vpop.f32.mrb[9].mxu1 }
 0x578   :  { %v1532_v32 = vadd.f32 %v1531_v31, %v1332_v27  ;;  %v1533_v33 = vpop.f32.mrb[10].mxu1 }
 0x579   :  { %v1536_v44 = vmax.f32 %v1530_v30, 0.0  ;;  %v1534_v35 = vpop.f32.mrb[11].mxu1 }
 0x57a   :  { %v1537_v46 = vmax.f32 %v1532_v32, 0.0 }
 0x57b   :  { %v1538_v37 = vadd.f32 %v1536_v44, %v2101_v54 }
 0x57c   :  { %v1539_v39 = vadd.f32 %v2035_v38, %v1537_v46 }
 0x57d   :  { %1540 = vst [vmem:[%s2172_s3] sm:$0xff] %v1538_v37 }
 0x57e   :  { %1541 = vst [vmem:[%s2172_s3 + $0x8] sm:$0xff] %v1539_v39 }
 0x57f   :  { %1546 = vsyncpa [#allocation3], 1 }

</bundles_post_ra>
